<compile_context>
chip_gen: v5e
topology: v5e:2x2
jax: 0.10.0
libtpu: 0.0.40
codegen_flags: <defaults>
</compile_context>

<pallas_src>
import functools

import numpy as np
import jax
import jax.numpy as jnp
from jax.experimental import pallas as pl
from jax.experimental.pallas import tpu as pltpu


def get_pe(n_position: int, d_model: int) -> np.ndarray:
    """Same table as PE_add_Embedding.getPE (cast to float32 like torch.FloatTensor)."""
    pos = np.arange(n_position, dtype=np.float64)[:, None]
    i = np.arange(d_model, dtype=np.float64)[None, :]
    angle = pos / np.power(10000.0, 2.0 * np.floor(i / 2.0) / d_model)
    pe = np.zeros((n_position, d_model), dtype=np.float64)
    pe[:, 0::2] = np.sin(angle[:, 0::2])
    pe[:, 1::2] = np.cos(angle[:, 1::2])
    return pe.astype(np.float32)


# ----------------------------------------------------------------------------------------------
# Path 1: word-embedding table stays in HBM; rows gathered with manual DMAs, cross-step
#         double-buffered and waited on with a single aggregate semaphore per slot.
# ----------------------------------------------------------------------------------------------
def _pe_hbm_gather_kernel(ids_ref, pe_ref, wemb_hbm_ref, o_ref,
                          row_buf, row_sems, *, tq, unroll):
    # ids_ref      : SMEM (B*S_pad,) int32 flat token ids (scalar prefetch)
    # pe_ref       : VMEM (TQ, D) positional block (auto-pipelined via BlockSpec)
    # wemb_hbm_ref : (V, D) word-embedding table left in HBM (memory_space=pl.ANY)
    # o_ref        : (TQ, D) output block (lane-dense, full unmasked stores)
    # row_buf      : (2*TQ, D) VMEM double buffer for gathered rows (two TQ-row halves)
    # row_sems     : (2,) DMA semaphores, one aggregate semaphore per half
    b = pl.program_id(0)
    j = pl.program_id(1)
    nj = pl.num_programs(1)
    slot = j % 2

    def issue_rows(block_j, into_slot):
        # Gather the TQ embedding rows of block (b, block_j) into half `into_slot`,
        # all signalling the SAME semaphore so a single aggregate wait suffices.
        tok_base = (b * nj + block_j) * tq
        buf_base = into_slot * tq

        def start_one(t, carry):
            row = ids_ref[tok_base + t]
            pltpu.make_async_copy(
                wemb_hbm_ref.at[pl.ds(row, 1), :],
                row_buf.at[pl.ds(buf_base + t, 1), :],
                row_sems.at[into_slot],
            ).start()
            return carry

        jax.lax.fori_loop(0, tq, start_one, 0, unroll=unroll)

    # Prologue: at the start of every batch row fetch its first block into the current slot.
    @pl.when(j == 0)
    def _():
        issue_rows(0, slot)

    # Prefetch the next block of this batch row into the other slot BEFORE waiting, so its
    # HBM latency is hidden behind this block's add + output writeback.
    @pl.when(j + 1 < nj)
    def _():
        issue_rows(j + 1, 1 - slot)

    # Single aggregate wait: the TQ row copies each signalled row_sems[slot] with one row's
    # bytes; a (TQ, D)-sized descriptor consumes the total in one wait (only size + sem matter).
    cur_start = pl.multiple_of(slot * tq, tq)
    cur = pl.ds(cur_start, tq)
    pltpu.make_async_copy(row_buf.at[cur, :], row_buf.at[cur, :], row_sems.at[slot]).wait()

    o_ref[...] = row_buf[cur, :] + pe_ref[...]
    # Dropout with p=0.0 is the identity (module default), so nothing more to do.


# ----------------------------------------------------------------------------------------------
# Path 2 (small-vocab fast path): whole (V, D) table VMEM-resident; in-VMEM dynamic row gather.
# ----------------------------------------------------------------------------------------------
def _pe_vmem_gather_kernel(ids_ref, pe_ref, wemb_ref, o_ref, stage, *, tq, unroll):
    b = pl.program_id(0)
    j = pl.program_id(1)
    nj = pl.num_programs(1)
    tok_base = (b * nj + j) * tq

    def gather_one(t, carry):
        row = ids_ref[tok_base + t]
        stage[pl.ds(t, 1), :] = wemb_ref[pl.ds(row, 1), :]
        return carry

    jax.lax.fori_loop(0, tq, gather_one, 0, unroll=unroll)

    # Vectorized add + one full lane-dense store.
    o_ref[...] = stage[...] + pe_ref[...]


# ----------------------------------------------------------------------------------------------
# Wrapper
# ----------------------------------------------------------------------------------------------
def _pick_tq(seq_len: int, d_pad: int, *, max_tq=None,
             target_block_bytes: int = 512 * 1024) -> int:
    """Largest multiple-of-8 tile that keeps one (TQ, D) buffer ~<= target and <= padded S."""
    cap = 1024 if max_tq is None else max(8, (max_tq // 8) * 8)
    row_bytes = d_pad * 4
    tq = max(8, min(cap, (target_block_bytes // row_bytes) // 8 * 8))
    s8 = max(8, ((seq_len + 7) // 8) * 8)
    return min(tq, s8)


def _vmem_limit_bytes(required_bytes: int) -> int:
    """Budget the scoped VMEM limit from actual buffer sizes, bounded by physical capacity."""
    try:
        phys = int(getattr(pltpu.get_tpu_info(), "vmem_capacity_bytes", 64 << 20))
    except Exception:
        phys = 64 << 20   # v7x per-TC physical; conservative lower bound across generations
    want = required_bytes + (4 << 20)           # headroom for compiler-internal scratch
    return int(min(max(want, 16 << 20), (phys * 3) // 4))


def pe_add_embedding(ids, word_emb, pos_emb, *, force_hbm_gather=False, max_tq=None,
                     vmem_vocab_max_bytes=8 * 1024 * 1024):
    """ids: (B, S) int32; word_emb: (V, D) f32; pos_emb: (maxpos+1, D) f32 -> (B, S, D) f32."""
    B, S = ids.shape
    V, D = word_emb.shape
    if pos_emb.shape[0] < S + 1:
        raise ValueError("maxpos must be >= sequence length")

    D_pad = ((D + 127) // 128) * 128            # lane-dense stores / full-width row transfers
    TQ = _pick_tq(S, D_pad, max_tq=max_tq)
    S_pad = ((S + TQ - 1) // TQ) * TQ           # ragged S handled by padding + final slice
    nj = S_pad // TQ

    # Scalar-prefetched flat ids; clamp defensively (Pallas does no bounds check on DMA sources).
    # TODO(synk): for very large B*S, prefetch ids per block via an SMEM BlockSpec instead of
    #             the whole flat array (1-D SMEM pads to the next power of two).
    ids_p = jnp.pad(ids.astype(jnp.int32), ((0, 0), (0, S_pad - S)))
    flat_ids = jnp.clip(ids_p.reshape(-1), 0, V - 1)

    # Positions used by the module are 1..S (torch.range(1, sen_len) is 1-based inclusive).
    pe_slice = pos_emb[1:S + 1].astype(jnp.float32)
    pe_slice = jnp.pad(pe_slice, ((0, S_pad - S), (0, D_pad - D)))      # (S_pad, D_pad)

    wemb = word_emb.astype(jnp.float32)
    if D_pad != D:
        wemb = jnp.pad(wemb, ((0, 0), (0, D_pad - D)))

    blk_bytes = TQ * D_pad * 4
    vocab_bytes = V * D_pad * 4
    use_vmem_vocab = (not force_hbm_gather) and vocab_bytes <= vmem_vocab_max_bytes
    unroll = True if TQ <= 32 else 8            # don't fully unroll big gather loops

    if use_vmem_vocab:
        kernel = functools.partial(_pe_vmem_gather_kernel, tq=TQ, unroll=unroll)
        wemb_spec = pl.BlockSpec(memory_space=pltpu.MemorySpace.VMEM)   # whole table resident
        scratch_shapes = [pltpu.VMEM((TQ, D_pad), jnp.float32)]
        dim_sem = ("parallel", "parallel")      # no cross-step scratch state
        required = 5 * blk_bytes + vocab_bytes  # 2x out + 2x pe + stage + resident vocab
    else:
        kernel = functools.partial(_pe_hbm_gather_kernel, tq=TQ, unroll=unroll)
        wemb_spec = pl.BlockSpec(memory_space=pl.ANY)                   # table stays in HBM
        scratch_shapes = [
            pltpu.VMEM((2 * TQ, D_pad), jnp.float32),   # cross-step double-buffered gather
            pltpu.SemaphoreType.DMA((2,)),              # one aggregate semaphore per half
        ]
        dim_sem = ("parallel", "arbitrary")     # scratch state crosses the inner axis only
        required = 6 * blk_bytes                # 2x out + 2x pe + 2x gather halves

    out_flat = pl.pallas_call(
        kernel,
        out_shape=jax.ShapeDtypeStruct((B * S_pad, D_pad), jnp.float32),
        grid_spec=pltpu.PrefetchScalarGridSpec(
            num_scalar_prefetch=1,
            grid=(B, nj),
            in_specs=[
                pl.BlockSpec((TQ, D_pad), lambda b, j, ids_ref: (j, 0)),  # PE via auto-pipeline
                wemb_spec,
            ],
            out_specs=pl.BlockSpec((TQ, D_pad), lambda b, j, ids_ref: (b * nj + j, 0)),
            scratch_shapes=scratch_shapes,
        ),
        compiler_params=pltpu.CompilerParams(
            dimension_semantics=dim_sem,
            vmem_limit_bytes=_vmem_limit_bytes(required),
        ),
    )(flat_ids, pe_slice, wemb)

    return out_flat.reshape(B, S_pad, D_pad)[:, :S, :D]


if __name__ == "__main__":
    key = jax.random.PRNGKey(0)
    k_ids_a, k_ids_b, k_emb = jax.random.split(key, 3)

    # --- Case A: small shapes consistent with the module forward; small vocab -> in-VMEM
    #     resident vocabulary fast path.
    batch, seq, vocab, dim, maxpos = 2, 8, 256, 128, 32
    word_emb = jax.random.normal(k_emb, (vocab, dim), dtype=jnp.float32)
    pos_emb = jnp.asarray(get_pe(maxpos + 1, dim))      # frozen sinusoidal table
    ids_a = jax.random.randint(k_ids_a, (batch, seq), 0, vocab, dtype=jnp.int32)

    out_a = jax.block_until_ready(pe_add_embedding(ids_a, word_emb, pos_emb))
    ref_a = word_emb[ids_a] + pos_emb[jnp.arange(1, seq + 1)][None, :, :]
    assert out_a.shape == (batch, seq, dim)
    np.testing.assert_allclose(np.asarray(out_a), np.asarray(ref_a), rtol=1e-6, atol=1e-6)

    # --- Case B: ragged sequence length + forced HBM row-gather path with a small TQ so the
    #     grid has several inner steps and the cross-step double buffer / aggregate wait run.
    seq_b = 13
    ids_b = jax.random.randint(k_ids_b, (batch, seq_b), 0, vocab, dtype=jnp.int32)
    out_b = jax.block_until_ready(
        pe_add_embedding(ids_b, word_emb, pos_emb, force_hbm_gather=True, max_tq=8))
    ref_b = word_emb[ids_b] + pos_emb[jnp.arange(1, seq_b + 1)][None, :, :]
    assert out_b.shape == (batch, seq_b, dim)
    np.testing.assert_allclose(np.asarray(out_b), np.asarray(ref_b), rtol=1e-6, atol=1e-6)

    print("KERNEL_OK")
</pallas_src>

<mosaic_0001>
module attributes {stable_mosaic.version = 11 : i64} {
  func.func @_pe_vmem_gather_kernel(%arg0: i32, %arg1: i32, %arg2: memref<16xi32, #tpu.memory_space<smem>>, %arg3: memref<8x128xf32, #tpu.memory_space<vmem>>, %arg4: memref<256x128xf32, #tpu.memory_space<vmem>>, %arg5: memref<8x128xf32, #tpu.memory_space<vmem>>, %arg6: memref<8x128xf32, #tpu.memory_space<vmem>>) attributes {dimension_semantics = [#tpu.dimension_semantics<parallel>, #tpu.dimension_semantics<parallel>], iteration_bounds = array<i64: 2, 1>, scalar_prefetch = 1 : i64, scratch_operands = 1 : i64, tpu.core_type = #tpu.core_type<tc>, window_params = [{transform_indices = @transform_0, window_bounds = array<i64: 8, 128>}, {pipeline_mode = #tpu.pipeline_mode<synchronous>, transform_indices = @transform_1, window_bounds = array<i64: 256, 128>}, {transform_indices = @transform_2, window_bounds = array<i64: 8, 128>}]} {
    %c1_i32 = arith.constant 1 : i32
    %0 = arith.muli %arg0, %c1_i32 : i32
    %1 = arith.addi %0, %arg1 : i32
    %c8_i32 = arith.constant 8 : i32
    %2 = arith.muli %1, %c8_i32 : i32
    %c0_i32 = arith.constant 0 : i32
    %3 = arith.addi %2, %c0_i32 : i32
    %4 = arith.index_cast %3 : i32 to index
    %5 = memref.load %arg2[%4] : memref<16xi32, #tpu.memory_space<smem>>
    %6 = arith.index_cast %5 : i32 to index
    %c0 = arith.constant 0 : index
    %7 = vector.load %arg4[%6, %c0] : memref<256x128xf32, #tpu.memory_space<vmem>>, vector<1x128xf32>
    %8 = arith.index_cast %c0_i32 : i32 to index
    %c0_0 = arith.constant 0 : index
    %9 = vector.load %arg6[%8, %c0_0] : memref<8x128xf32, #tpu.memory_space<vmem>>, vector<1x128xf32>
    tpu.vector_store %arg6[%8, %c0_0], %7 {strides = array<i32>} : memref<8x128xf32, #tpu.memory_space<vmem>>, vector<1x128xf32>,
    %c1_i32_1 = arith.constant 1 : i32
    %10 = arith.addi %2, %c1_i32_1 : i32
    %11 = arith.index_cast %10 : i32 to index
    %12 = memref.load %arg2[%11] : memref<16xi32, #tpu.memory_space<smem>>
    %13 = arith.index_cast %12 : i32 to index
    %c0_2 = arith.constant 0 : index
    %14 = vector.load %arg4[%13, %c0_2] : memref<256x128xf32, #tpu.memory_space<vmem>>, vector<1x128xf32>
    %15 = arith.index_cast %c1_i32_1 : i32 to index
    %c0_3 = arith.constant 0 : index
    %16 = vector.load %arg6[%15, %c0_3] : memref<8x128xf32, #tpu.memory_space<vmem>>, vector<1x128xf32>
    tpu.vector_store %arg6[%15, %c0_3], %14 {strides = array<i32>} : memref<8x128xf32, #tpu.memory_space<vmem>>, vector<1x128xf32>,
    %c2_i32 = arith.constant 2 : i32
    %17 = arith.addi %2, %c2_i32 : i32
    %18 = arith.index_cast %17 : i32 to index
    %19 = memref.load %arg2[%18] : memref<16xi32, #tpu.memory_space<smem>>
    %20 = arith.index_cast %19 : i32 to index
    %c0_4 = arith.constant 0 : index
    %21 = vector.load %arg4[%20, %c0_4] : memref<256x128xf32, #tpu.memory_space<vmem>>, vector<1x128xf32>
    %22 = arith.index_cast %c2_i32 : i32 to index
    %c0_5 = arith.constant 0 : index
    %23 = vector.load %arg6[%22, %c0_5] : memref<8x128xf32, #tpu.memory_space<vmem>>, vector<1x128xf32>
    tpu.vector_store %arg6[%22, %c0_5], %21 {strides = array<i32>} : memref<8x128xf32, #tpu.memory_space<vmem>>, vector<1x128xf32>,
    %c3_i32 = arith.constant 3 : i32
    %24 = arith.addi %2, %c3_i32 : i32
    %25 = arith.index_cast %24 : i32 to index
    %26 = memref.load %arg2[%25] : memref<16xi32, #tpu.memory_space<smem>>
    %27 = arith.index_cast %26 : i32 to index
    %c0_6 = arith.constant 0 : index
    %28 = vector.load %arg4[%27, %c0_6] : memref<256x128xf32, #tpu.memory_space<vmem>>, vector<1x128xf32>
    %29 = arith.index_cast %c3_i32 : i32 to index
    %c0_7 = arith.constant 0 : index
    %30 = vector.load %arg6[%29, %c0_7] : memref<8x128xf32, #tpu.memory_space<vmem>>, vector<1x128xf32>
    tpu.vector_store %arg6[%29, %c0_7], %28 {strides = array<i32>} : memref<8x128xf32, #tpu.memory_space<vmem>>, vector<1x128xf32>,
    %c4_i32 = arith.constant 4 : i32
    %31 = arith.addi %2, %c4_i32 : i32
    %32 = arith.index_cast %31 : i32 to index
    %33 = memref.load %arg2[%32] : memref<16xi32, #tpu.memory_space<smem>>
    %34 = arith.index_cast %33 : i32 to index
    %c0_8 = arith.constant 0 : index
    %35 = vector.load %arg4[%34, %c0_8] : memref<256x128xf32, #tpu.memory_space<vmem>>, vector<1x128xf32>
    %36 = arith.index_cast %c4_i32 : i32 to index
    %c0_9 = arith.constant 0 : index
    %37 = vector.load %arg6[%36, %c0_9] : memref<8x128xf32, #tpu.memory_space<vmem>>, vector<1x128xf32>
    tpu.vector_store %arg6[%36, %c0_9], %35 {strides = array<i32>} : memref<8x128xf32, #tpu.memory_space<vmem>>, vector<1x128xf32>,
    %c5_i32 = arith.constant 5 : i32
    %38 = arith.addi %2, %c5_i32 : i32
    %39 = arith.index_cast %38 : i32 to index
    %40 = memref.load %arg2[%39] : memref<16xi32, #tpu.memory_space<smem>>
    %41 = arith.index_cast %40 : i32 to index
    %c0_10 = arith.constant 0 : index
    %42 = vector.load %arg4[%41, %c0_10] : memref<256x128xf32, #tpu.memory_space<vmem>>, vector<1x128xf32>
    %43 = arith.index_cast %c5_i32 : i32 to index
    %c0_11 = arith.constant 0 : index
    %44 = vector.load %arg6[%43, %c0_11] : memref<8x128xf32, #tpu.memory_space<vmem>>, vector<1x128xf32>
    tpu.vector_store %arg6[%43, %c0_11], %42 {strides = array<i32>} : memref<8x128xf32, #tpu.memory_space<vmem>>, vector<1x128xf32>,
    %c6_i32 = arith.constant 6 : i32
    %45 = arith.addi %2, %c6_i32 : i32
    %46 = arith.index_cast %45 : i32 to index
    %47 = memref.load %arg2[%46] : memref<16xi32, #tpu.memory_space<smem>>
    %48 = arith.index_cast %47 : i32 to index
    %c0_12 = arith.constant 0 : index
    %49 = vector.load %arg4[%48, %c0_12] : memref<256x128xf32, #tpu.memory_space<vmem>>, vector<1x128xf32>
    %50 = arith.index_cast %c6_i32 : i32 to index
    %c0_13 = arith.constant 0 : index
    %51 = vector.load %arg6[%50, %c0_13] : memref<8x128xf32, #tpu.memory_space<vmem>>, vector<1x128xf32>
    tpu.vector_store %arg6[%50, %c0_13], %49 {strides = array<i32>} : memref<8x128xf32, #tpu.memory_space<vmem>>, vector<1x128xf32>,
    %c7_i32 = arith.constant 7 : i32
    %52 = arith.addi %2, %c7_i32 : i32
    %53 = arith.index_cast %52 : i32 to index
    %54 = memref.load %arg2[%53] : memref<16xi32, #tpu.memory_space<smem>>
    %55 = arith.index_cast %54 : i32 to index
    %c0_14 = arith.constant 0 : index
    %56 = vector.load %arg4[%55, %c0_14] : memref<256x128xf32, #tpu.memory_space<vmem>>, vector<1x128xf32>
    %57 = arith.index_cast %c7_i32 : i32 to index
    %c0_15 = arith.constant 0 : index
    %58 = vector.load %arg6[%57, %c0_15] : memref<8x128xf32, #tpu.memory_space<vmem>>, vector<1x128xf32>
    tpu.vector_store %arg6[%57, %c0_15], %56 {strides = array<i32>} : memref<8x128xf32, #tpu.memory_space<vmem>>, vector<1x128xf32>,
    %c8_i32_16 = arith.constant 8 : i32
    %c0_17 = arith.constant 0 : index
    %c0_18 = arith.constant 0 : index
    %59 = vector.load %arg6[%c0_17, %c0_18] : memref<8x128xf32, #tpu.memory_space<vmem>>, vector<8x128xf32>
    %c0_19 = arith.constant 0 : index
    %c0_20 = arith.constant 0 : index
    %60 = vector.load %arg3[%c0_19, %c0_20] : memref<8x128xf32, #tpu.memory_space<vmem>>, vector<8x128xf32>
    %61 = arith.addf %59, %60 : vector<8x128xf32>
    %c0_21 = arith.constant 0 : index
    %c0_22 = arith.constant 0 : index
    %62 = vector.load %arg5[%c0_21, %c0_22] : memref<8x128xf32, #tpu.memory_space<vmem>>, vector<8x128xf32>
    tpu.vector_store %arg5[%c0_21, %c0_22], %61 {strides = array<i32>} : memref<8x128xf32, #tpu.memory_space<vmem>>, vector<8x128xf32>,
    return
  }
  func.func @transform_0(%arg0: i32, %arg1: i32, %arg2: memref<16xi32, #tpu.memory_space<smem>>) -> (i32, i32) {
    %c0_i32 = arith.constant 0 : i32
    %c0_i32_0 = arith.constant 0 : i32
    return %arg1, %c0_i32 : i32, i32
  }
  func.func @transform_1(%arg0: i32, %arg1: i32, %arg2: memref<16xi32, #tpu.memory_space<smem>>) -> (i32, i32) {
    %c0_i32 = arith.constant 0 : i32
    %c0_i32_0 = arith.constant 0 : i32
    %c0_i32_1 = arith.constant 0 : i32
    return %c0_i32, %c0_i32_0 : i32, i32
  }
  func.func @transform_2(%arg0: i32, %arg1: i32, %arg2: memref<16xi32, #tpu.memory_space<smem>>) -> (i32, i32) {
    %c1_i32 = arith.constant 1 : i32
    %0 = arith.muli %arg0, %c1_i32 : i32
    %1 = arith.addi %0, %arg1 : i32
    %c0_i32 = arith.constant 0 : i32
    %c0_i32_0 = arith.constant 0 : i32
    return %1, %c0_i32 : i32, i32
  }
}

</mosaic_0001>

<bundles_post_ra>
// kernel: tpu_custom_call.1
= control target key start
LH: loop header
LB: loop body
LE: loop exit
PB: predicated region body
PF: predicated region fallthrough
CT: control target
= control target key end

     0   :  { %s590_s15 = smov [#allocation4]   ;;  %s749_s0 = inlined_call_operand.hbm [shape: s32[16], index: 0, kind: input, shape index: {}]   ;;  %s750_s1 = inlined_call_operand.hbm [shape: f32[8,128], index: 1, kind: input, shape index: {}]   ;;  %s751_s2 = inlined_call_operand.hbm [shape: f32[256,128], index: 2, kind: input, shape index: {}]   ;;  %s752_s3 = inlined_call_operand.hbm [shape: f32[16,128], index: 3, kind: output, shape index: {}]  }
   0x1   :  { %s9_s14 = sshll.u32 %s749_s0, 4  ;;  %s10_s14 = int_to_ptr.hbm [resolvable:$true] %s9_s14 }
   0x2   :  { %12 = dma.hbm_to_smem %s10_s14, 16, %s590_s15, [#allocation3] }
   0x3   :  { %552 = dma.done.wait [#allocation3], 16 }
   0x4   :  { %553 = vsyncadd [#allocation3], 4294967280 }
   0x5   :  { %15 = sfence }
   0x6   :  { %16 = vsyncpa [#allocation6], 0 }
   0x7   :  { %17 = vsyncpa [#allocation9], 0 }
   0x8   :  { %18 = vsyncpa [#allocation7], 0 }
   0x9   :  { %20 = vsyncpa [#allocation7 + $0x1], 0  ;;  %s618_s16 = smov 0   ;;  %s620_s17 = smov 0  }
   0xa   :  { %s622_s18 = smov 0   ;;  %s624_s19 = smov 0  }
   0xb   :  { %s626_s20 = smov 0   ;;  %s628_s0 = smov 0  }
   0xc LB: > { %s335_s21 = sadd.s32 4294967295, %s588_s0   ;;  %s336_s22 = sadd.s32 4294967294, %s588_s0   ;;  %s588_s0 = sphi %s628_s0, %s26_s0   ;;  %s584_s20 = sphi %s626_s20, %s761_s20   ;;  %s580_s19 = sphi %s624_s19, %s760_s19   ;;  %s576_s18 = sphi %s622_s18, %s759_s18   ;;  %s572_s17 = sphi %s620_s17, %s758_s17   ;;  %s568_s16 = sphi %s618_s16, %s757_s16  }
   0xd   : > { %s38_s23 = sadd.s32 1, %s584_s20  ;;  %s94_s24 = sadd.s32 1, %s576_s18 }
   0xe   : > { %p40_p0 = scmp.ge.s32.totalorder %s38_s23, 2  ;;  %p104_p1 = scmp.ne.s32.totalorder %s576_s18, %s572_s17 }
   0xf   : > { %p105_p2 = scmp.eq.s32.totalorder %s335_s21, 1  ;;  %p110_p3 = scmp.ne.s32.totalorder %s572_s17, %s568_s16 }
  0x10   : > { %s763_s23 = smov (%p40_p0, %s38_s23), 0  ;;  %p111_p5 = scmp.eq.s32.totalorder %s336_s22, 1 }
  0x11   : > { %p658_p4 = por %p105_p2, %p104_p1  ;;  %s91_s26 = ssub.s32 %s584_s20, %s763_s23 }
  0x12   : > { %p337_p6 = scmp.ge.s32.totalorder %s588_s0, 1  ;;  %p92_p7 = scmp.eq.s32.totalorder %s91_s26, 0 }
  0x13   : > { %p665_p8 = por %p111_p5, %p110_p3  ;;  %p118_p9 = scmp.lt.s32.totalorder %s588_s0, 3 }
  0x14   : > { %s671_s28 = scalar_select %p92_p7, %s576_s18, %s94_s24  }
  0x15   : > { %p673_p10 = pnand %p337_p6, %p118_p9  ;;  %p677_p11 = scmp.eq.s32.totalorder %s335_s21, 0 }
  0x16   : > { %s132_s6 = sshll.u32 %s750_s1, 4  ;;  %s591_s7 = smov [#allocation5]   ;;  %s133_s6 = int_to_ptr.hbm [resolvable:$true] %s132_s6 }
  0x17   : > { %p359_p12 = pneg %p673_p10  ;;  %s134_s8 = sshll.u32 %s591_s7, 4  ;;  %s135_s8 = int_to_ptr.vmem [resolvable:$true] %s134_s8 }
  0x18   : > { %s143_s11 = sshll.u32 %s751_s2, 4  ;;  %s592_s12 = smov [#allocation8]   ;;  %s144_s11 = int_to_ptr.hbm [resolvable:$true] %s143_s11 }
  0x19   : > { %p360_p13 = pnand %p677_p11, %p359_p12  ;;  %s145_s13 = sshll.u32 %s592_s12, 4  ;;  %s146_s13 = int_to_ptr.vmem [resolvable:$true] %s145_s13 }
  0x1a   : > { %s593_s14 = smov 128   ;;  %s594_s15 = smov 8  }
  0x1b   : > { %362 = dma.hbm_to_vmem [thread:$0]  (!%p360_p13), %s133_s6, 128, %s135_s8, [#allocation6]  }
  0x1c   : > { %365 = dma.hbm_to_vmem [thread:$0]  (!%p360_p13), %s144_s11, 4096, %s146_s13, [#allocation9], %s593_s14, %s593_s14, %s594_s15  }
  0x1d   : > { %161 = sbr.rel (%p673_p10) target bundleno = 67 (0x43), region = 28 }
  0x22   : > { %555 = dma.done.wait (%p677_p11), [#allocation6], 128  }
  0x23   : > { %557 = vsyncadd (%p677_p11), [#allocation6], 4294967168 }
  0x24   : > { %559 = dma.done.wait (%p677_p11), [#allocation9], 4096  }
  0x25   : > { %561 = vsyncadd (%p677_p11), [#allocation9], 4294963200  ;;  %s702_s21 = sshll.u32 %s580_s19, 3  ;;  %v227_v8 = vld [vmem:[#allocation5] sm:$0xff] }
  0x26   : > { %s187_s22 = sld [smem:[#allocation4 + %s702_s21]]  ;;  %s191_s24 = sadd.s32 1, %s702_s21 }
  0x27   : > { %s192_s26 = sld [smem:[#allocation4 + %s191_s24]]  ;;  %s196_s29 = sadd.s32 2, %s702_s21 }
  0x28   : > { %s197_s4 = sld [smem:[#allocation4 + %s196_s29]]  ;;  %s201_s5 = sadd.s32 3, %s702_s21 }
  0x29   : > { %s202_s6 = sld [smem:[#allocation4 + %s201_s5]]  ;;  %s206_s30 = sadd.s32 4, %s702_s21 }
  0x2a   : > { %s207_s7 = sld [smem:[#allocation4 + %s206_s30]]  ;;  %s211_s8 = sadd.s32 5, %s702_s21 }
  0x2b   : > { %s212_s19 = sld [smem:[#allocation4 + %s211_s8]]  ;;  %s216_s9 = sadd.s32 6, %s702_s21 }
  0x2c   : > { %s217_s10 = sld [smem:[#allocation4 + %s216_s9]]  ;;  %s188_s11 = scalar_lea.vmem [#allocation8], %s187_s22 }
  0x2d   : > { %v189_v0 = vld [vmem:[%s188_s11] sm:$0x1]  ;;  %s221_s12 = sadd.s32 7, %s702_s21  ;;  %s193_s13 = scalar_lea.vmem [#allocation8], %s192_s26 }
  0x2e   : > { %190 = vst [vmem:[#allocation2] sm:$0x1] %v189_v0  ;;  %v194_v1 = vld [vmem:[%s193_s13] sm:$0x1]  ;;  %s222_s14 = sld [smem:[#allocation4 + %s221_s12]]  ;;  %s198_s15 = scalar_lea.vmem [#allocation8], %s197_s4 }
  0x2f   : > { %195 = vst [vmem:[#allocation2 + $0x1] sm:$0x1] %v194_v1  ;;  %v199_v2 = vld [vmem:[%s198_s15] sm:$0x1]  ;;  %s203_s24 = scalar_lea.vmem [#allocation8], %s202_s6  ;;  %s181_s22 = sand.u32 1, %s572_s17  }
  0x30   : > { %200 = vst [vmem:[#allocation2 + $0x2] sm:$0x1] %v199_v2  ;;  %v204_v3 = vld [vmem:[%s203_s24] sm:$0x1]  ;;  %s208_s29 = scalar_lea.vmem [#allocation8], %s207_s7  ;;  %s343_s8 = sshll.u32 %s181_s22, 3 }
  0x31   : > { %205 = vst [vmem:[#allocation2 + $0x3] sm:$0x1] %v204_v3  ;;  %v209_v4 = vld [vmem:[%s208_s29] sm:$0x1]  ;;  %s213_s5 = scalar_lea.vmem [#allocation8], %s212_s19  ;;  %s242_s6 = scalar_lea.hbm %s752_s3, %s702_s21 }
  0x32   : > { %210 = vst [vmem:[#allocation2 + $0x4] sm:$0x1] %v209_v4  ;;  %v214_v5 = vld [vmem:[%s213_s5] sm:$0x1]  ;;  %s218_s30 = scalar_lea.vmem [#allocation8], %s217_s10  ;;  %s183_s7 = scalar_lea.vmem [#allocation10], %s343_s8 }
  0x33   : > { %215 = vst [vmem:[#allocation2 + $0x5] sm:$0x1] %v214_v5  ;;  %v219_v6 = vld [vmem:[%s218_s30] sm:$0x1]  ;;  %s244_s11 = sshll.u32 %s183_s7, 4  ;;  %s246_s12 = sshll.u32 %s242_s6, 4  ;;  %s245_s11 = int_to_ptr.vmem [resolvable:$true] %s244_s11  ;;  %s247_s12 = int_to_ptr.hbm [resolvable:$true] %s246_s12 }
  0x34   : > { %220 = vst [vmem:[#allocation2 + $0x6] sm:$0x1] %v219_v6  ;;  %s223_s26 = scalar_lea.vmem [#allocation8], %s222_s14  ;;  %s231_s19 = scalar_lea.sflag [#allocation7], %s181_s22 }
  0x35   : > { %v224_v7 = vld [vmem:[%s223_s26] sm:$0x1]  ;;  %s514_s10 = sshra.s32 %s247_s12, 4  ;;  %s520_s21 = scalar_lea.hbm %s752_s3, 16  ;;  %s515_s10 = int_to_ptr.hbm [resolvable:$true] %s514_s10 }
  0x36   : > { %225 = vst [vmem:[#allocation2 + $0x7] sm:$0x1] %v224_v7  ;;  %s516_s13 = scalar_lea.hbm %s515_s10, 8  ;;  %p521_p3 = scmp.lt.s32.totalorder %s515_s10, %s752_s3 }
  0x37   : > { %p517_p0 = scmp.ne.s32.totalorder %s515_s10, %s516_s13  ;;  %p522_p5 = scmp.lt.s32.totalorder %s520_s21, %s516_s13 }
  0x39   : > { %p518_p1 = pnand %p517_p0, %p658_p4  ;;  %p523_p6 = por %p522_p5, %p521_p3 }
  0x3b   : > { %p519_p2 = pneg %p518_p1 }
  0x3d   : > { %v226_v9 = vld [vmem:[#allocation2] sm:$0xff]  ;;  %p524_p7 = pnand %p523_p6, %p519_p2 }
  0x3e   : > { %v228_v10 = vadd.f32 %v227_v8, %v226_v9 }
  0x40   : > { %229 = vst [vmem:[%s183_s7] sm:$0xff] %v228_v10 }
  0x41   : > { %527 = shalt.err (!%p524_p7)
}
  0x42   : > { %357 = dma.vmem_to_hbm [thread:$0]  (%p658_p4), %s245_s11, 128, %s247_s12, %s231_s19  }
  0x43 PF: > { %p374_p9 = scmp.ge.s32.totalorder %s588_s0, 2  ;;  %s258_s5 = sand.u32 1, %s568_s16  }
  0x44   : > { %s259_s22 = scalar_lea.sflag [#allocation7], %s258_s5 }
  0x45   : > { %p367_p10 = pnand %p374_p9, %p665_p8 }
  0x47   : > { %p368_p11 = pneg %p367_p10 }
  0x49   : > { %563 = dma.done.wait (%p368_p11), %s259_s22, 128  }
  0x4a   : > { %565 = vsyncadd (%p368_p11), %s259_s22, 4294967168  ;;  %s26_s0 = sadd.s32 1, %s588_s0   ;;  %s757_s16 = smov %s572_s17 }
  0x4b   : > { %p23_p12 = scmp.ge.s32.totalorder %s26_s0, 4   ;;  %s758_s17 = smov %s576_s18 }
  0x4c   : > { %s759_s18 = smov %s671_s28  ;;  %s760_s19 = smov %s584_s20 }
  0x4d   : > { %s761_s20 = smov %s763_s23  ;;  %25 = sbr.rel (!%p23_p12) target bundleno = 12 (0xc), region = 78 }
  0x52   :  { %265 = vsyncpa [#allocation6], 1 }
  0x53   :  { %267 = vsyncpa [#allocation6 + $0x1], 1 }
  0x54   :  { %268 = vsyncpa [#allocation9], 1 }
  0x55   :  { %269 = vsyncpa [#allocation7], 1 }
  0x56   :  { %271 = vsyncpa [#allocation7 + $0x1], 1 }

</bundles_post_ra>
